<compile_context>
chip_gen: v7x
topology: tpu7x:2x2x1
jax: 0.10.0
libtpu: 0.0.40
codegen_flags: <defaults>
</compile_context>

<pallas_src>
import jax
import jax.numpy as jnp
from jax.experimental import pallas as pl
from jax.experimental.pallas import tpu as pltpu


# Layer sizes, PyTorch convention: (out_features, in_features)
_LAYER_DIMS = [(6, 8), (4, 6), (2, 4), (1, 2)]

_S_MAX = 1024  # max sublane-groups per grid step: x block = 8*1024*128*4 B = 4 MiB


def _round_up(n, m):
    return (n + m - 1) // m * m


def _cdiv(a, b):
    return (a + b - 1) // b


def mlp_kernel(x_ref,
               w1_ref, b1_ref,
               w2_ref, b2_ref,
               w3_ref, b3_ref,
               w4_ref, b4_ref,
               o_ref):
    # x_ref : (8, S, 128) f32 in VMEM  -- x_ref[i] is a dense (S, 128) slab of feature i
    # w*_ref: (out, in)   f32 in SMEM, b*_ref: (out,) f32 in SMEM
    # o_ref : (S, 128)    f32 in VMEM

    def layer(rows_in, w_ref, b_ref):
        """VPU broadcast-FMA chain: out_row[j] = relu(sum_i W[j,i] * rows_in[i] + b[j])."""
        n_out, n_in = w_ref.shape
        out_rows = []
        for j in range(n_out):                      # fully unrolled (dims are 1..8)
            acc = rows_in[0] * w_ref[j, 0]          # SMEM scalar x dense (S,128) vreg slab
            for i in range(1, n_in):
                acc = acc + rows_in[i] * w_ref[j, i]
            acc = acc + b_ref[j]
            out_rows.append(jnp.maximum(acc, 0.0))  # ReLU after every layer
        return out_rows

    # Eight dense (S, 128) per-feature slabs (full-vreg utilization).
    rows = [x_ref[i] for i in range(8)]

    rows = layer(rows, w1_ref, b1_ref)   # 8 -> 6
    rows = layer(rows, w2_ref, b2_ref)   # 6 -> 4
    rows = layer(rows, w3_ref, b3_ref)   # 4 -> 2
    rows = layer(rows, w4_ref, b4_ref)   # 2 -> 1

    o_ref[...] = rows[0]                 # lane-dense, unmasked full-width store


def _choose_tiling(batch):
    """Pick (S, N_pad): S = sublane-groups (of 128 batch columns) per grid step,
    N_pad = total padded sublane-groups. S*128 is always a multiple of 128."""
    n_grp = _cdiv(batch, 128)
    if n_grp <= 16:
        # Tiny batch: one grid step, block == full array (no extra padding).
        s = n_grp
    else:
        # Aim for ~8 grid steps (pipelining + v7x dual-TC sharding), 8-aligned
        # blocks to satisfy the (8, 128) divisibility rule, capped for VMEM.
        s = min(_S_MAX, _round_up(_cdiv(n_grp, 8), 8))
    n_pad = _round_up(n_grp, s)
    return s, n_pad


def mlp_forward(x, params):
    """x: (B, 8) float32 (PyTorch layout). params: (w1,b1,...,w4,b4), w as (out,in), b as (out,).
    Returns (B, 1) float32."""
    B, F = x.shape
    assert F == 8, f"expected 8 input features, got {F}"

    S, n_grp_pad = _choose_tiling(B)
    b_pad = n_grp_pad * 128
    grid = n_grp_pad // S

    # Single relayout pass: (B,8) -> pad -> (8, N_pad, 128) with batch dense on
    # sublanes x lanes. Padded columns are zeros; their garbage outputs are sliced off.
    x_pad = x if b_pad == B else jnp.pad(x, ((0, b_pad - B), (0, 0)))
    x_3d = jnp.transpose(x_pad).reshape(8, n_grp_pad, 128)

    smem_spec = pl.BlockSpec(memory_space=pltpu.MemorySpace.SMEM)  # whole tiny array in SMEM

    out = pl.pallas_call(
        mlp_kernel,
        out_shape=jax.ShapeDtypeStruct((n_grp_pad, 128), jnp.float32),
        grid=(grid,),
        in_specs=[pl.BlockSpec((8, S, 128), lambda i: (0, i, 0))] + [smem_spec] * 8,
        out_specs=pl.BlockSpec((S, 128), lambda i: (i, 0)),
        compiler_params=pltpu.CompilerParams(
            dimension_semantics=("parallel",),    # shard batch tiles across TCs on v7x
            vmem_limit_bytes=32 * 1024 * 1024,    # >> ~9 MiB peak use; safe on v5e/v6e/v7x
        ),
    )(x_3d, *params)

    # Row-major (N_pad, 128) is exactly batch order -> free reshape, then drop padding.
    return out.reshape(b_pad, 1)[:B]


def init_params(key):
    """Deterministic PyTorch-style init: U(-1/sqrt(fan_in), 1/sqrt(fan_in)).
    Weights stored as (out_features, in_features) (torch layout), biases as (out_features,)."""
    params = []
    for (fan_out, fan_in) in _LAYER_DIMS:
        key, kw, kb = jax.random.split(key, 3)
        bound = 1.0 / jnp.sqrt(float(fan_in))
        w = jax.random.uniform(kw, (fan_out, fan_in), jnp.float32, -bound, bound)
        b = jax.random.uniform(kb, (fan_out,), jnp.float32, -bound, bound)
        params += [w, b]
    return tuple(params)


def reference_forward(x, params):
    w1, b1, w2, b2, w3, b3, w4, b4 = params
    h = jnp.maximum(x @ w1.T + b1, 0.0)
    h = jnp.maximum(h @ w2.T + b2, 0.0)
    h = jnp.maximum(h @ w3.T + b3, 0.0)
    h = jnp.maximum(h @ w4.T + b4, 0.0)
    return h


if __name__ == "__main__":
    key = jax.random.PRNGKey(0)
    kx, kx2, kp = jax.random.split(key, 3)
    params = init_params(kp)

    # Small batch, consistent with the tutorial model (8 input features).
    B = 8
    x = jax.random.normal(kx, (B, 8), jnp.float32)
    y = jax.block_until_ready(mlp_forward(x, params))
    y_ref = reference_forward(x, params)
    assert y.shape == (B, 1), y.shape
    assert jnp.allclose(y, y_ref, atol=1e-5, rtol=1e-5), (y, y_ref)

    # Second check: exercises padding + multi-step grid (grid=3, S=8).
    B2 = 2500
    x2 = jax.random.normal(kx2, (B2, 8), jnp.float32)
    y2 = jax.block_until_ready(mlp_forward(x2, params))
    y2_ref = reference_forward(x2, params)
    assert y2.shape == (B2, 1), y2.shape
    assert jnp.allclose(y2, y2_ref, atol=1e-5, rtol=1e-5)

    print("KERNEL_OK")
</pallas_src>

<mosaic_0001>
module attributes {stable_mosaic.version = 11 : i64} {
  func.func @mlp_kernel(%arg0: i32, %arg1: memref<8x1x128xf32, #tpu.memory_space<vmem>>, %arg2: memref<6x8xf32, #tpu.memory_space<smem>>, %arg3: memref<6xf32, #tpu.memory_space<smem>>, %arg4: memref<4x6xf32, #tpu.memory_space<smem>>, %arg5: memref<4xf32, #tpu.memory_space<smem>>, %arg6: memref<2x4xf32, #tpu.memory_space<smem>>, %arg7: memref<2xf32, #tpu.memory_space<smem>>, %arg8: memref<1x2xf32, #tpu.memory_space<smem>>, %arg9: memref<1xf32, #tpu.memory_space<smem>>, %arg10: memref<1x128xf32, #tpu.memory_space<vmem>>) attributes {dimension_semantics = [#tpu.dimension_semantics<parallel>], iteration_bounds = array<i64: 1>, scalar_prefetch = 0 : i64, scratch_operands = 0 : i64, tpu.core_type = #tpu.core_type<tc>, window_params = [{transform_indices = @transform_0, window_bounds = array<i64: 8, 1, 128>}, {transform_indices = @transform_1, window_bounds = array<i64: 6, 8>}, {transform_indices = @transform_2, window_bounds = array<i64: 6>}, {transform_indices = @transform_3, window_bounds = array<i64: 4, 6>}, {transform_indices = @transform_4, window_bounds = array<i64: 4>}, {transform_indices = @transform_5, window_bounds = array<i64: 2, 4>}, {transform_indices = @transform_6, window_bounds = array<i64: 2>}, {transform_indices = @transform_7, window_bounds = array<i64: 1, 2>}, {transform_indices = @transform_8, window_bounds = array<i64: 1>}, {transform_indices = @transform_9, window_bounds = array<i64: 1, 128>}]} {
    %c0 = arith.constant 0 : index
    %c0_0 = arith.constant 0 : index
    %c0_1 = arith.constant 0 : index
    %0 = vector.load %arg1[%c0, %c0_0, %c0_1] : memref<8x1x128xf32, #tpu.memory_space<vmem>>, vector<1x1x128xf32>
    %1 = vector.shape_cast %0 : vector<1x1x128xf32> to vector<1x128xf32>
    %c1 = arith.constant 1 : index
    %c0_2 = arith.constant 0 : index
    %c0_3 = arith.constant 0 : index
    %2 = vector.load %arg1[%c1, %c0_2, %c0_3] : memref<8x1x128xf32, #tpu.memory_space<vmem>>, vector<1x1x128xf32>
    %3 = vector.shape_cast %2 : vector<1x1x128xf32> to vector<1x128xf32>
    %c2 = arith.constant 2 : index
    %c0_4 = arith.constant 0 : index
    %c0_5 = arith.constant 0 : index
    %4 = vector.load %arg1[%c2, %c0_4, %c0_5] : memref<8x1x128xf32, #tpu.memory_space<vmem>>, vector<1x1x128xf32>
    %5 = vector.shape_cast %4 : vector<1x1x128xf32> to vector<1x128xf32>
    %c3 = arith.constant 3 : index
    %c0_6 = arith.constant 0 : index
    %c0_7 = arith.constant 0 : index
    %6 = vector.load %arg1[%c3, %c0_6, %c0_7] : memref<8x1x128xf32, #tpu.memory_space<vmem>>, vector<1x1x128xf32>
    %7 = vector.shape_cast %6 : vector<1x1x128xf32> to vector<1x128xf32>
    %c4 = arith.constant 4 : index
    %c0_8 = arith.constant 0 : index
    %c0_9 = arith.constant 0 : index
    %8 = vector.load %arg1[%c4, %c0_8, %c0_9] : memref<8x1x128xf32, #tpu.memory_space<vmem>>, vector<1x1x128xf32>
    %9 = vector.shape_cast %8 : vector<1x1x128xf32> to vector<1x128xf32>
    %c5 = arith.constant 5 : index
    %c0_10 = arith.constant 0 : index
    %c0_11 = arith.constant 0 : index
    %10 = vector.load %arg1[%c5, %c0_10, %c0_11] : memref<8x1x128xf32, #tpu.memory_space<vmem>>, vector<1x1x128xf32>
    %11 = vector.shape_cast %10 : vector<1x1x128xf32> to vector<1x128xf32>
    %c6 = arith.constant 6 : index
    %c0_12 = arith.constant 0 : index
    %c0_13 = arith.constant 0 : index
    %12 = vector.load %arg1[%c6, %c0_12, %c0_13] : memref<8x1x128xf32, #tpu.memory_space<vmem>>, vector<1x1x128xf32>
    %13 = vector.shape_cast %12 : vector<1x1x128xf32> to vector<1x128xf32>
    %c7 = arith.constant 7 : index
    %c0_14 = arith.constant 0 : index
    %c0_15 = arith.constant 0 : index
    %14 = vector.load %arg1[%c7, %c0_14, %c0_15] : memref<8x1x128xf32, #tpu.memory_space<vmem>>, vector<1x1x128xf32>
    %15 = vector.shape_cast %14 : vector<1x1x128xf32> to vector<1x128xf32>
    %c0_16 = arith.constant 0 : index
    %c0_17 = arith.constant 0 : index
    %16 = memref.load %arg2[%c0_16, %c0_17] : memref<6x8xf32, #tpu.memory_space<smem>>
    %17 = vector.broadcast %16 : f32 to vector<1x128xf32>
    %18 = arith.mulf %1, %17 : vector<1x128xf32>
    %c0_18 = arith.constant 0 : index
    %c1_19 = arith.constant 1 : index
    %19 = memref.load %arg2[%c0_18, %c1_19] : memref<6x8xf32, #tpu.memory_space<smem>>
    %20 = vector.broadcast %19 : f32 to vector<1x128xf32>
    %21 = arith.mulf %3, %20 : vector<1x128xf32>
    %22 = arith.addf %18, %21 : vector<1x128xf32>
    %c0_20 = arith.constant 0 : index
    %c2_21 = arith.constant 2 : index
    %23 = memref.load %arg2[%c0_20, %c2_21] : memref<6x8xf32, #tpu.memory_space<smem>>
    %24 = vector.broadcast %23 : f32 to vector<1x128xf32>
    %25 = arith.mulf %5, %24 : vector<1x128xf32>
    %26 = arith.addf %22, %25 : vector<1x128xf32>
    %c0_22 = arith.constant 0 : index
    %c3_23 = arith.constant 3 : index
    %27 = memref.load %arg2[%c0_22, %c3_23] : memref<6x8xf32, #tpu.memory_space<smem>>
    %28 = vector.broadcast %27 : f32 to vector<1x128xf32>
    %29 = arith.mulf %7, %28 : vector<1x128xf32>
    %30 = arith.addf %26, %29 : vector<1x128xf32>
    %c0_24 = arith.constant 0 : index
    %c4_25 = arith.constant 4 : index
    %31 = memref.load %arg2[%c0_24, %c4_25] : memref<6x8xf32, #tpu.memory_space<smem>>
    %32 = vector.broadcast %31 : f32 to vector<1x128xf32>
    %33 = arith.mulf %9, %32 : vector<1x128xf32>
    %34 = arith.addf %30, %33 : vector<1x128xf32>
    %c0_26 = arith.constant 0 : index
    %c5_27 = arith.constant 5 : index
    %35 = memref.load %arg2[%c0_26, %c5_27] : memref<6x8xf32, #tpu.memory_space<smem>>
    %36 = vector.broadcast %35 : f32 to vector<1x128xf32>
    %37 = arith.mulf %11, %36 : vector<1x128xf32>
    %38 = arith.addf %34, %37 : vector<1x128xf32>
    %c0_28 = arith.constant 0 : index
    %c6_29 = arith.constant 6 : index
    %39 = memref.load %arg2[%c0_28, %c6_29] : memref<6x8xf32, #tpu.memory_space<smem>>
    %40 = vector.broadcast %39 : f32 to vector<1x128xf32>
    %41 = arith.mulf %13, %40 : vector<1x128xf32>
    %42 = arith.addf %38, %41 : vector<1x128xf32>
    %c0_30 = arith.constant 0 : index
    %c7_31 = arith.constant 7 : index
    %43 = memref.load %arg2[%c0_30, %c7_31] : memref<6x8xf32, #tpu.memory_space<smem>>
    %44 = vector.broadcast %43 : f32 to vector<1x128xf32>
    %45 = arith.mulf %15, %44 : vector<1x128xf32>
    %46 = arith.addf %42, %45 : vector<1x128xf32>
    %c0_32 = arith.constant 0 : index
    %47 = memref.load %arg3[%c0_32] : memref<6xf32, #tpu.memory_space<smem>>
    %48 = vector.broadcast %47 : f32 to vector<1x128xf32>
    %49 = arith.addf %46, %48 : vector<1x128xf32>
    %cst = arith.constant 0.000000e+00 : f32
    %50 = vector.broadcast %cst : f32 to vector<1x128xf32>
    %51 = arith.maximumf %49, %50 : vector<1x128xf32>
    %c1_33 = arith.constant 1 : index
    %c0_34 = arith.constant 0 : index
    %52 = memref.load %arg2[%c1_33, %c0_34] : memref<6x8xf32, #tpu.memory_space<smem>>
    %53 = vector.broadcast %52 : f32 to vector<1x128xf32>
    %54 = arith.mulf %1, %53 : vector<1x128xf32>
    %c1_35 = arith.constant 1 : index
    %c1_36 = arith.constant 1 : index
    %55 = memref.load %arg2[%c1_35, %c1_36] : memref<6x8xf32, #tpu.memory_space<smem>>
    %56 = vector.broadcast %55 : f32 to vector<1x128xf32>
    %57 = arith.mulf %3, %56 : vector<1x128xf32>
    %58 = arith.addf %54, %57 : vector<1x128xf32>
    %c1_37 = arith.constant 1 : index
    %c2_38 = arith.constant 2 : index
    %59 = memref.load %arg2[%c1_37, %c2_38] : memref<6x8xf32, #tpu.memory_space<smem>>
    %60 = vector.broadcast %59 : f32 to vector<1x128xf32>
    %61 = arith.mulf %5, %60 : vector<1x128xf32>
    %62 = arith.addf %58, %61 : vector<1x128xf32>
    %c1_39 = arith.constant 1 : index
    %c3_40 = arith.constant 3 : index
    %63 = memref.load %arg2[%c1_39, %c3_40] : memref<6x8xf32, #tpu.memory_space<smem>>
    %64 = vector.broadcast %63 : f32 to vector<1x128xf32>
    %65 = arith.mulf %7, %64 : vector<1x128xf32>
    %66 = arith.addf %62, %65 : vector<1x128xf32>
    %c1_41 = arith.constant 1 : index
    %c4_42 = arith.constant 4 : index
    %67 = memref.load %arg2[%c1_41, %c4_42] : memref<6x8xf32, #tpu.memory_space<smem>>
    %68 = vector.broadcast %67 : f32 to vector<1x128xf32>
    %69 = arith.mulf %9, %68 : vector<1x128xf32>
    %70 = arith.addf %66, %69 : vector<1x128xf32>
    %c1_43 = arith.constant 1 : index
    %c5_44 = arith.constant 5 : index
    %71 = memref.load %arg2[%c1_43, %c5_44] : memref<6x8xf32, #tpu.memory_space<smem>>
    %72 = vector.broadcast %71 : f32 to vector<1x128xf32>
    %73 = arith.mulf %11, %72 : vector<1x128xf32>
    %74 = arith.addf %70, %73 : vector<1x128xf32>
    %c1_45 = arith.constant 1 : index
    %c6_46 = arith.constant 6 : index
    %75 = memref.load %arg2[%c1_45, %c6_46] : memref<6x8xf32, #tpu.memory_space<smem>>
    %76 = vector.broadcast %75 : f32 to vector<1x128xf32>
    %77 = arith.mulf %13, %76 : vector<1x128xf32>
    %78 = arith.addf %74, %77 : vector<1x128xf32>
    %c1_47 = arith.constant 1 : index
    %c7_48 = arith.constant 7 : index
    %79 = memref.load %arg2[%c1_47, %c7_48] : memref<6x8xf32, #tpu.memory_space<smem>>
    %80 = vector.broadcast %79 : f32 to vector<1x128xf32>
    %81 = arith.mulf %15, %80 : vector<1x128xf32>
    %82 = arith.addf %78, %81 : vector<1x128xf32>
    %c1_49 = arith.constant 1 : index
    %83 = memref.load %arg3[%c1_49] : memref<6xf32, #tpu.memory_space<smem>>
    %84 = vector.broadcast %83 : f32 to vector<1x128xf32>
    %85 = arith.addf %82, %84 : vector<1x128xf32>
    %cst_50 = arith.constant 0.000000e+00 : f32
    %86 = vector.broadcast %cst_50 : f32 to vector<1x128xf32>
    %87 = arith.maximumf %85, %86 : vector<1x128xf32>
    %c2_51 = arith.constant 2 : index
    %c0_52 = arith.constant 0 : index
    %88 = memref.load %arg2[%c2_51, %c0_52] : memref<6x8xf32, #tpu.memory_space<smem>>
    %89 = vector.broadcast %88 : f32 to vector<1x128xf32>
    %90 = arith.mulf %1, %89 : vector<1x128xf32>
    %c2_53 = arith.constant 2 : index
    %c1_54 = arith.constant 1 : index
    %91 = memref.load %arg2[%c2_53, %c1_54] : memref<6x8xf32, #tpu.memory_space<smem>>
    %92 = vector.broadcast %91 : f32 to vector<1x128xf32>
    %93 = arith.mulf %3, %92 : vector<1x128xf32>
    %94 = arith.addf %90, %93 : vector<1x128xf32>
    %c2_55 = arith.constant 2 : index
    %c2_56 = arith.constant 2 : index
    %95 = memref.load %arg2[%c2_55, %c2_56] : memref<6x8xf32, #tpu.memory_space<smem>>
    %96 = vector.broadcast %95 : f32 to vector<1x128xf32>
    %97 = arith.mulf %5, %96 : vector<1x128xf32>
    %98 = arith.addf %94, %97 : vector<1x128xf32>
    %c2_57 = arith.constant 2 : index
    %c3_58 = arith.constant 3 : index
    %99 = memref.load %arg2[%c2_57, %c3_58] : memref<6x8xf32, #tpu.memory_space<smem>>
    %100 = vector.broadcast %99 : f32 to vector<1x128xf32>
    %101 = arith.mulf %7, %100 : vector<1x128xf32>
    %102 = arith.addf %98, %101 : vector<1x128xf32>
    %c2_59 = arith.constant 2 : index
    %c4_60 = arith.constant 4 : index
    %103 = memref.load %arg2[%c2_59, %c4_60] : memref<6x8xf32, #tpu.memory_space<smem>>
    %104 = vector.broadcast %103 : f32 to vector<1x128xf32>
    %105 = arith.mulf %9, %104 : vector<1x128xf32>
    %106 = arith.addf %102, %105 : vector<1x128xf32>
    %c2_61 = arith.constant 2 : index
    %c5_62 = arith.constant 5 : index
    %107 = memref.load %arg2[%c2_61, %c5_62] : memref<6x8xf32, #tpu.memory_space<smem>>
    %108 = vector.broadcast %107 : f32 to vector<1x128xf32>
    %109 = arith.mulf %11, %108 : vector<1x128xf32>
    %110 = arith.addf %106, %109 : vector<1x128xf32>
    %c2_63 = arith.constant 2 : index
    %c6_64 = arith.constant 6 : index
    %111 = memref.load %arg2[%c2_63, %c6_64] : memref<6x8xf32, #tpu.memory_space<smem>>
    %112 = vector.broadcast %111 : f32 to vector<1x128xf32>
    %113 = arith.mulf %13, %112 : vector<1x128xf32>
    %114 = arith.addf %110, %113 : vector<1x128xf32>
    %c2_65 = arith.constant 2 : index
    %c7_66 = arith.constant 7 : index
    %115 = memref.load %arg2[%c2_65, %c7_66] : memref<6x8xf32, #tpu.memory_space<smem>>
    %116 = vector.broadcast %115 : f32 to vector<1x128xf32>
    %117 = arith.mulf %15, %116 : vector<1x128xf32>
    %118 = arith.addf %114, %117 : vector<1x128xf32>
    %c2_67 = arith.constant 2 : index
    %119 = memref.load %arg3[%c2_67] : memref<6xf32, #tpu.memory_space<smem>>
    %120 = vector.broadcast %119 : f32 to vector<1x128xf32>
    %121 = arith.addf %118, %120 : vector<1x128xf32>
    %cst_68 = arith.constant 0.000000e+00 : f32
    %122 = vector.broadcast %cst_68 : f32 to vector<1x128xf32>
    %123 = arith.maximumf %121, %122 : vector<1x128xf32>
    %c3_69 = arith.constant 3 : index
    %c0_70 = arith.constant 0 : index
    %124 = memref.load %arg2[%c3_69, %c0_70] : memref<6x8xf32, #tpu.memory_space<smem>>
    %125 = vector.broadcast %124 : f32 to vector<1x128xf32>
    %126 = arith.mulf %1, %125 : vector<1x128xf32>
    %c3_71 = arith.constant 3 : index
    %c1_72 = arith.constant 1 : index
    %127 = memref.load %arg2[%c3_71, %c1_72] : memref<6x8xf32, #tpu.memory_space<smem>>
    %128 = vector.broadcast %127 : f32 to vector<1x128xf32>
    %129 = arith.mulf %3, %128 : vector<1x128xf32>
    %130 = arith.addf %126, %129 : vector<1x128xf32>
    %c3_73 = arith.constant 3 : index
    %c2_74 = arith.constant 2 : index
    %131 = memref.load %arg2[%c3_73, %c2_74] : memref<6x8xf32, #tpu.memory_space<smem>>
    %132 = vector.broadcast %131 : f32 to vector<1x128xf32>
    %133 = arith.mulf %5, %132 : vector<1x128xf32>
    %134 = arith.addf %130, %133 : vector<1x128xf32>
    %c3_75 = arith.constant 3 : index
    %c3_76 = arith.constant 3 : index
    %135 = memref.load %arg2[%c3_75, %c3_76] : memref<6x8xf32, #tpu.memory_space<smem>>
    %136 = vector.broadcast %135 : f32 to vector<1x128xf32>
    %137 = arith.mulf %7, %136 : vector<1x128xf32>
    %138 = arith.addf %134, %137 : vector<1x128xf32>
    %c3_77 = arith.constant 3 : index
    %c4_78 = arith.constant 4 : index
    %139 = memref.load %arg2[%c3_77, %c4_78] : memref<6x8xf32, #tpu.memory_space<smem>>
    %140 = vector.broadcast %139 : f32 to vector<1x128xf32>
    %141 = arith.mulf %9, %140 : vector<1x128xf32>
    %142 = arith.addf %138, %141 : vector<1x128xf32>
    %c3_79 = arith.constant 3 : index
    %c5_80 = arith.constant 5 : index
    %143 = memref.load %arg2[%c3_79, %c5_80] : memref<6x8xf32, #tpu.memory_space<smem>>
    %144 = vector.broadcast %143 : f32 to vector<1x128xf32>
    %145 = arith.mulf %11, %144 : vector<1x128xf32>
    %146 = arith.addf %142, %145 : vector<1x128xf32>
    %c3_81 = arith.constant 3 : index
    %c6_82 = arith.constant 6 : index
    %147 = memref.load %arg2[%c3_81, %c6_82] : memref<6x8xf32, #tpu.memory_space<smem>>
    %148 = vector.broadcast %147 : f32 to vector<1x128xf32>
    %149 = arith.mulf %13, %148 : vector<1x128xf32>
    %150 = arith.addf %146, %149 : vector<1x128xf32>
    %c3_83 = arith.constant 3 : index
    %c7_84 = arith.constant 7 : index
    %151 = memref.load %arg2[%c3_83, %c7_84] : memref<6x8xf32, #tpu.memory_space<smem>>
    %152 = vector.broadcast %151 : f32 to vector<1x128xf32>
    %153 = arith.mulf %15, %152 : vector<1x128xf32>
    %154 = arith.addf %150, %153 : vector<1x128xf32>
    %c3_85 = arith.constant 3 : index
    %155 = memref.load %arg3[%c3_85] : memref<6xf32, #tpu.memory_space<smem>>
    %156 = vector.broadcast %155 : f32 to vector<1x128xf32>
    %157 = arith.addf %154, %156 : vector<1x128xf32>
    %cst_86 = arith.constant 0.000000e+00 : f32
    %158 = vector.broadcast %cst_86 : f32 to vector<1x128xf32>
    %159 = arith.maximumf %157, %158 : vector<1x128xf32>
    %c4_87 = arith.constant 4 : index
    %c0_88 = arith.constant 0 : index
    %160 = memref.load %arg2[%c4_87, %c0_88] : memref<6x8xf32, #tpu.memory_space<smem>>
    %161 = vector.broadcast %160 : f32 to vector<1x128xf32>
    %162 = arith.mulf %1, %161 : vector<1x128xf32>
    %c4_89 = arith.constant 4 : index
    %c1_90 = arith.constant 1 : index
    %163 = memref.load %arg2[%c4_89, %c1_90] : memref<6x8xf32, #tpu.memory_space<smem>>
    %164 = vector.broadcast %163 : f32 to vector<1x128xf32>
    %165 = arith.mulf %3, %164 : vector<1x128xf32>
    %166 = arith.addf %162, %165 : vector<1x128xf32>
    %c4_91 = arith.constant 4 : index
    %c2_92 = arith.constant 2 : index
    %167 = memref.load %arg2[%c4_91, %c2_92] : memref<6x8xf32, #tpu.memory_space<smem>>
    %168 = vector.broadcast %167 : f32 to vector<1x128xf32>
    %169 = arith.mulf %5, %168 : vector<1x128xf32>
    %170 = arith.addf %166, %169 : vector<1x128xf32>
    %c4_93 = arith.constant 4 : index
    %c3_94 = arith.constant 3 : index
    %171 = memref.load %arg2[%c4_93, %c3_94] : memref<6x8xf32, #tpu.memory_space<smem>>
    %172 = vector.broadcast %171 : f32 to vector<1x128xf32>
    %173 = arith.mulf %7, %172 : vector<1x128xf32>
    %174 = arith.addf %170, %173 : vector<1x128xf32>
    %c4_95 = arith.constant 4 : index
    %c4_96 = arith.constant 4 : index
    %175 = memref.load %arg2[%c4_95, %c4_96] : memref<6x8xf32, #tpu.memory_space<smem>>
    %176 = vector.broadcast %175 : f32 to vector<1x128xf32>
    %177 = arith.mulf %9, %176 : vector<1x128xf32>
    %178 = arith.addf %174, %177 : vector<1x128xf32>
    %c4_97 = arith.constant 4 : index
    %c5_98 = arith.constant 5 : index
    %179 = memref.load %arg2[%c4_97, %c5_98] : memref<6x8xf32, #tpu.memory_space<smem>>
    %180 = vector.broadcast %179 : f32 to vector<1x128xf32>
    %181 = arith.mulf %11, %180 : vector<1x128xf32>
    %182 = arith.addf %178, %181 : vector<1x128xf32>
    %c4_99 = arith.constant 4 : index
    %c6_100 = arith.constant 6 : index
    %183 = memref.load %arg2[%c4_99, %c6_100] : memref<6x8xf32, #tpu.memory_space<smem>>
    %184 = vector.broadcast %183 : f32 to vector<1x128xf32>
    %185 = arith.mulf %13, %184 : vector<1x128xf32>
    %186 = arith.addf %182, %185 : vector<1x128xf32>
    %c4_101 = arith.constant 4 : index
    %c7_102 = arith.constant 7 : index
    %187 = memref.load %arg2[%c4_101, %c7_102] : memref<6x8xf32, #tpu.memory_space<smem>>
    %188 = vector.broadcast %187 : f32 to vector<1x128xf32>
    %189 = arith.mulf %15, %188 : vector<1x128xf32>
    %190 = arith.addf %186, %189 : vector<1x128xf32>
    %c4_103 = arith.constant 4 : index
    %191 = memref.load %arg3[%c4_103] : memref<6xf32, #tpu.memory_space<smem>>
    %192 = vector.broadcast %191 : f32 to vector<1x128xf32>
    %193 = arith.addf %190, %192 : vector<1x128xf32>
    %cst_104 = arith.constant 0.000000e+00 : f32
    %194 = vector.broadcast %cst_104 : f32 to vector<1x128xf32>
    %195 = arith.maximumf %193, %194 : vector<1x128xf32>
    %c5_105 = arith.constant 5 : index
    %c0_106 = arith.constant 0 : index
    %196 = memref.load %arg2[%c5_105, %c0_106] : memref<6x8xf32, #tpu.memory_space<smem>>
    %197 = vector.broadcast %196 : f32 to vector<1x128xf32>
    %198 = arith.mulf %1, %197 : vector<1x128xf32>
    %c5_107 = arith.constant 5 : index
    %c1_108 = arith.constant 1 : index
    %199 = memref.load %arg2[%c5_107, %c1_108] : memref<6x8xf32, #tpu.memory_space<smem>>
    %200 = vector.broadcast %199 : f32 to vector<1x128xf32>
    %201 = arith.mulf %3, %200 : vector<1x128xf32>
    %202 = arith.addf %198, %201 : vector<1x128xf32>
    %c5_109 = arith.constant 5 : index
    %c2_110 = arith.constant 2 : index
    %203 = memref.load %arg2[%c5_109, %c2_110] : memref<6x8xf32, #tpu.memory_space<smem>>
    %204 = vector.broadcast %203 : f32 to vector<1x128xf32>
    %205 = arith.mulf %5, %204 : vector<1x128xf32>
    %206 = arith.addf %202, %205 : vector<1x128xf32>
    %c5_111 = arith.constant 5 : index
    %c3_112 = arith.constant 3 : index
    %207 = memref.load %arg2[%c5_111, %c3_112] : memref<6x8xf32, #tpu.memory_space<smem>>
    %208 = vector.broadcast %207 : f32 to vector<1x128xf32>
    %209 = arith.mulf %7, %208 : vector<1x128xf32>
    %210 = arith.addf %206, %209 : vector<1x128xf32>
    %c5_113 = arith.constant 5 : index
    %c4_114 = arith.constant 4 : index
    %211 = memref.load %arg2[%c5_113, %c4_114] : memref<6x8xf32, #tpu.memory_space<smem>>
    %212 = vector.broadcast %211 : f32 to vector<1x128xf32>
    %213 = arith.mulf %9, %212 : vector<1x128xf32>
    %214 = arith.addf %210, %213 : vector<1x128xf32>
    %c5_115 = arith.constant 5 : index
    %c5_116 = arith.constant 5 : index
    %215 = memref.load %arg2[%c5_115, %c5_116] : memref<6x8xf32, #tpu.memory_space<smem>>
    %216 = vector.broadcast %215 : f32 to vector<1x128xf32>
    %217 = arith.mulf %11, %216 : vector<1x128xf32>
    %218 = arith.addf %214, %217 : vector<1x128xf32>
    %c5_117 = arith.constant 5 : index
    %c6_118 = arith.constant 6 : index
    %219 = memref.load %arg2[%c5_117, %c6_118] : memref<6x8xf32, #tpu.memory_space<smem>>
    %220 = vector.broadcast %219 : f32 to vector<1x128xf32>
    %221 = arith.mulf %13, %220 : vector<1x128xf32>
    %222 = arith.addf %218, %221 : vector<1x128xf32>
    %c5_119 = arith.constant 5 : index
    %c7_120 = arith.constant 7 : index
    %223 = memref.load %arg2[%c5_119, %c7_120] : memref<6x8xf32, #tpu.memory_space<smem>>
    %224 = vector.broadcast %223 : f32 to vector<1x128xf32>
    %225 = arith.mulf %15, %224 : vector<1x128xf32>
    %226 = arith.addf %222, %225 : vector<1x128xf32>
    %c5_121 = arith.constant 5 : index
    %227 = memref.load %arg3[%c5_121] : memref<6xf32, #tpu.memory_space<smem>>
    %228 = vector.broadcast %227 : f32 to vector<1x128xf32>
    %229 = arith.addf %226, %228 : vector<1x128xf32>
    %cst_122 = arith.constant 0.000000e+00 : f32
    %230 = vector.broadcast %cst_122 : f32 to vector<1x128xf32>
    %231 = arith.maximumf %229, %230 : vector<1x128xf32>
    %c0_123 = arith.constant 0 : index
    %c0_124 = arith.constant 0 : index
    %232 = memref.load %arg4[%c0_123, %c0_124] : memref<4x6xf32, #tpu.memory_space<smem>>
    %233 = vector.broadcast %232 : f32 to vector<1x128xf32>
    %234 = arith.mulf %51, %233 : vector<1x128xf32>
    %c0_125 = arith.constant 0 : index
    %c1_126 = arith.constant 1 : index
    %235 = memref.load %arg4[%c0_125, %c1_126] : memref<4x6xf32, #tpu.memory_space<smem>>
    %236 = vector.broadcast %235 : f32 to vector<1x128xf32>
    %237 = arith.mulf %87, %236 : vector<1x128xf32>
    %238 = arith.addf %234, %237 : vector<1x128xf32>
    %c0_127 = arith.constant 0 : index
    %c2_128 = arith.constant 2 : index
    %239 = memref.load %arg4[%c0_127, %c2_128] : memref<4x6xf32, #tpu.memory_space<smem>>
    %240 = vector.broadcast %239 : f32 to vector<1x128xf32>
    %241 = arith.mulf %123, %240 : vector<1x128xf32>
    %242 = arith.addf %238, %241 : vector<1x128xf32>
    %c0_129 = arith.constant 0 : index
    %c3_130 = arith.constant 3 : index
    %243 = memref.load %arg4[%c0_129, %c3_130] : memref<4x6xf32, #tpu.memory_space<smem>>
    %244 = vector.broadcast %243 : f32 to vector<1x128xf32>
    %245 = arith.mulf %159, %244 : vector<1x128xf32>
    %246 = arith.addf %242, %245 : vector<1x128xf32>
    %c0_131 = arith.constant 0 : index
    %c4_132 = arith.constant 4 : index
    %247 = memref.load %arg4[%c0_131, %c4_132] : memref<4x6xf32, #tpu.memory_space<smem>>
    %248 = vector.broadcast %247 : f32 to vector<1x128xf32>
    %249 = arith.mulf %195, %248 : vector<1x128xf32>
    %250 = arith.addf %246, %249 : vector<1x128xf32>
    %c0_133 = arith.constant 0 : index
    %c5_134 = arith.constant 5 : index
    %251 = memref.load %arg4[%c0_133, %c5_134] : memref<4x6xf32, #tpu.memory_space<smem>>
    %252 = vector.broadcast %251 : f32 to vector<1x128xf32>
    %253 = arith.mulf %231, %252 : vector<1x128xf32>
    %254 = arith.addf %250, %253 : vector<1x128xf32>
    %c0_135 = arith.constant 0 : index
    %255 = memref.load %arg5[%c0_135] : memref<4xf32, #tpu.memory_space<smem>>
    %256 = vector.broadcast %255 : f32 to vector<1x128xf32>
    %257 = arith.addf %254, %256 : vector<1x128xf32>
    %cst_136 = arith.constant 0.000000e+00 : f32
    %258 = vector.broadcast %cst_136 : f32 to vector<1x128xf32>
    %259 = arith.maximumf %257, %258 : vector<1x128xf32>
    %c1_137 = arith.constant 1 : index
    %c0_138 = arith.constant 0 : index
    %260 = memref.load %arg4[%c1_137, %c0_138] : memref<4x6xf32, #tpu.memory_space<smem>>
    %261 = vector.broadcast %260 : f32 to vector<1x128xf32>
    %262 = arith.mulf %51, %261 : vector<1x128xf32>
    %c1_139 = arith.constant 1 : index
    %c1_140 = arith.constant 1 : index
    %263 = memref.load %arg4[%c1_139, %c1_140] : memref<4x6xf32, #tpu.memory_space<smem>>
    %264 = vector.broadcast %263 : f32 to vector<1x128xf32>
    %265 = arith.mulf %87, %264 : vector<1x128xf32>
    %266 = arith.addf %262, %265 : vector<1x128xf32>
    %c1_141 = arith.constant 1 : index
    %c2_142 = arith.constant 2 : index
    %267 = memref.load %arg4[%c1_141, %c2_142] : memref<4x6xf32, #tpu.memory_space<smem>>
    %268 = vector.broadcast %267 : f32 to vector<1x128xf32>
    %269 = arith.mulf %123, %268 : vector<1x128xf32>
    %270 = arith.addf %266, %269 : vector<1x128xf32>
    %c1_143 = arith.constant 1 : index
    %c3_144 = arith.constant 3 : index
    %271 = memref.load %arg4[%c1_143, %c3_144] : memref<4x6xf32, #tpu.memory_space<smem>>
    %272 = vector.broadcast %271 : f32 to vector<1x128xf32>
    %273 = arith.mulf %159, %272 : vector<1x128xf32>
    %274 = arith.addf %270, %273 : vector<1x128xf32>
    %c1_145 = arith.constant 1 : index
    %c4_146 = arith.constant 4 : index
    %275 = memref.load %arg4[%c1_145, %c4_146] : memref<4x6xf32, #tpu.memory_space<smem>>
    %276 = vector.broadcast %275 : f32 to vector<1x128xf32>
    %277 = arith.mulf %195, %276 : vector<1x128xf32>
    %278 = arith.addf %274, %277 : vector<1x128xf32>
    %c1_147 = arith.constant 1 : index
    %c5_148 = arith.constant 5 : index
    %279 = memref.load %arg4[%c1_147, %c5_148] : memref<4x6xf32, #tpu.memory_space<smem>>
    %280 = vector.broadcast %279 : f32 to vector<1x128xf32>
    %281 = arith.mulf %231, %280 : vector<1x128xf32>
    %282 = arith.addf %278, %281 : vector<1x128xf32>
    %c1_149 = arith.constant 1 : index
    %283 = memref.load %arg5[%c1_149] : memref<4xf32, #tpu.memory_space<smem>>
    %284 = vector.broadcast %283 : f32 to vector<1x128xf32>
    %285 = arith.addf %282, %284 : vector<1x128xf32>
    %cst_150 = arith.constant 0.000000e+00 : f32
    %286 = vector.broadcast %cst_150 : f32 to vector<1x128xf32>
    %287 = arith.maximumf %285, %286 : vector<1x128xf32>
    %c2_151 = arith.constant 2 : index
    %c0_152 = arith.constant 0 : index
    %288 = memref.load %arg4[%c2_151, %c0_152] : memref<4x6xf32, #tpu.memory_space<smem>>
    %289 = vector.broadcast %288 : f32 to vector<1x128xf32>
    %290 = arith.mulf %51, %289 : vector<1x128xf32>
    %c2_153 = arith.constant 2 : index
    %c1_154 = arith.constant 1 : index
    %291 = memref.load %arg4[%c2_153, %c1_154] : memref<4x6xf32, #tpu.memory_space<smem>>
    %292 = vector.broadcast %291 : f32 to vector<1x128xf32>
    %293 = arith.mulf %87, %292 : vector<1x128xf32>
    %294 = arith.addf %290, %293 : vector<1x128xf32>
    %c2_155 = arith.constant 2 : index
    %c2_156 = arith.constant 2 : index
    %295 = memref.load %arg4[%c2_155, %c2_156] : memref<4x6xf32, #tpu.memory_space<smem>>
    %296 = vector.broadcast %295 : f32 to vector<1x128xf32>
    %297 = arith.mulf %123, %296 : vector<1x128xf32>
    %298 = arith.addf %294, %297 : vector<1x128xf32>
    %c2_157 = arith.constant 2 : index
    %c3_158 = arith.constant 3 : index
    %299 = memref.load %arg4[%c2_157, %c3_158] : memref<4x6xf32, #tpu.memory_space<smem>>
    %300 = vector.broadcast %299 : f32 to vector<1x128xf32>
    %301 = arith.mulf %159, %300 : vector<1x128xf32>
    %302 = arith.addf %298, %301 : vector<1x128xf32>
    %c2_159 = arith.constant 2 : index
    %c4_160 = arith.constant 4 : index
    %303 = memref.load %arg4[%c2_159, %c4_160] : memref<4x6xf32, #tpu.memory_space<smem>>
    %304 = vector.broadcast %303 : f32 to vector<1x128xf32>
    %305 = arith.mulf %195, %304 : vector<1x128xf32>
    %306 = arith.addf %302, %305 : vector<1x128xf32>
    %c2_161 = arith.constant 2 : index
    %c5_162 = arith.constant 5 : index
    %307 = memref.load %arg4[%c2_161, %c5_162] : memref<4x6xf32, #tpu.memory_space<smem>>
    %308 = vector.broadcast %307 : f32 to vector<1x128xf32>
    %309 = arith.mulf %231, %308 : vector<1x128xf32>
    %310 = arith.addf %306, %309 : vector<1x128xf32>
    %c2_163 = arith.constant 2 : index
    %311 = memref.load %arg5[%c2_163] : memref<4xf32, #tpu.memory_space<smem>>
    %312 = vector.broadcast %311 : f32 to vector<1x128xf32>
    %313 = arith.addf %310, %312 : vector<1x128xf32>
    %cst_164 = arith.constant 0.000000e+00 : f32
    %314 = vector.broadcast %cst_164 : f32 to vector<1x128xf32>
    %315 = arith.maximumf %313, %314 : vector<1x128xf32>
    %c3_165 = arith.constant 3 : index
    %c0_166 = arith.constant 0 : index
    %316 = memref.load %arg4[%c3_165, %c0_166] : memref<4x6xf32, #tpu.memory_space<smem>>
    %317 = vector.broadcast %316 : f32 to vector<1x128xf32>
    %318 = arith.mulf %51, %317 : vector<1x128xf32>
    %c3_167 = arith.constant 3 : index
    %c1_168 = arith.constant 1 : index
    %319 = memref.load %arg4[%c3_167, %c1_168] : memref<4x6xf32, #tpu.memory_space<smem>>
    %320 = vector.broadcast %319 : f32 to vector<1x128xf32>
    %321 = arith.mulf %87, %320 : vector<1x128xf32>
    %322 = arith.addf %318, %321 : vector<1x128xf32>
    %c3_169 = arith.constant 3 : index
    %c2_170 = arith.constant 2 : index
    %323 = memref.load %arg4[%c3_169, %c2_170] : memref<4x6xf32, #tpu.memory_space<smem>>
    %324 = vector.broadcast %323 : f32 to vector<1x128xf32>
    %325 = arith.mulf %123, %324 : vector<1x128xf32>
    %326 = arith.addf %322, %325 : vector<1x128xf32>
    %c3_171 = arith.constant 3 : index
    %c3_172 = arith.constant 3 : index
    %327 = memref.load %arg4[%c3_171, %c3_172] : memref<4x6xf32, #tpu.memory_space<smem>>
    %328 = vector.broadcast %327 : f32 to vector<1x128xf32>
    %329 = arith.mulf %159, %328 : vector<1x128xf32>
    %330 = arith.addf %326, %329 : vector<1x128xf32>
    %c3_173 = arith.constant 3 : index
    %c4_174 = arith.constant 4 : index
    %331 = memref.load %arg4[%c3_173, %c4_174] : memref<4x6xf32, #tpu.memory_space<smem>>
    %332 = vector.broadcast %331 : f32 to vector<1x128xf32>
    %333 = arith.mulf %195, %332 : vector<1x128xf32>
    %334 = arith.addf %330, %333 : vector<1x128xf32>
    %c3_175 = arith.constant 3 : index
    %c5_176 = arith.constant 5 : index
    %335 = memref.load %arg4[%c3_175, %c5_176] : memref<4x6xf32, #tpu.memory_space<smem>>
    %336 = vector.broadcast %335 : f32 to vector<1x128xf32>
    %337 = arith.mulf %231, %336 : vector<1x128xf32>
    %338 = arith.addf %334, %337 : vector<1x128xf32>
    %c3_177 = arith.constant 3 : index
    %339 = memref.load %arg5[%c3_177] : memref<4xf32, #tpu.memory_space<smem>>
    %340 = vector.broadcast %339 : f32 to vector<1x128xf32>
    %341 = arith.addf %338, %340 : vector<1x128xf32>
    %cst_178 = arith.constant 0.000000e+00 : f32
    %342 = vector.broadcast %cst_178 : f32 to vector<1x128xf32>
    %343 = arith.maximumf %341, %342 : vector<1x128xf32>
    %c0_179 = arith.constant 0 : index
    %c0_180 = arith.constant 0 : index
    %344 = memref.load %arg6[%c0_179, %c0_180] : memref<2x4xf32, #tpu.memory_space<smem>>
    %345 = vector.broadcast %344 : f32 to vector<1x128xf32>
    %346 = arith.mulf %259, %345 : vector<1x128xf32>
    %c0_181 = arith.constant 0 : index
    %c1_182 = arith.constant 1 : index
    %347 = memref.load %arg6[%c0_181, %c1_182] : memref<2x4xf32, #tpu.memory_space<smem>>
    %348 = vector.broadcast %347 : f32 to vector<1x128xf32>
    %349 = arith.mulf %287, %348 : vector<1x128xf32>
    %350 = arith.addf %346, %349 : vector<1x128xf32>
    %c0_183 = arith.constant 0 : index
    %c2_184 = arith.constant 2 : index
    %351 = memref.load %arg6[%c0_183, %c2_184] : memref<2x4xf32, #tpu.memory_space<smem>>
    %352 = vector.broadcast %351 : f32 to vector<1x128xf32>
    %353 = arith.mulf %315, %352 : vector<1x128xf32>
    %354 = arith.addf %350, %353 : vector<1x128xf32>
    %c0_185 = arith.constant 0 : index
    %c3_186 = arith.constant 3 : index
    %355 = memref.load %arg6[%c0_185, %c3_186] : memref<2x4xf32, #tpu.memory_space<smem>>
    %356 = vector.broadcast %355 : f32 to vector<1x128xf32>
    %357 = arith.mulf %343, %356 : vector<1x128xf32>
    %358 = arith.addf %354, %357 : vector<1x128xf32>
    %c0_187 = arith.constant 0 : index
    %359 = memref.load %arg7[%c0_187] : memref<2xf32, #tpu.memory_space<smem>>
    %360 = vector.broadcast %359 : f32 to vector<1x128xf32>
    %361 = arith.addf %358, %360 : vector<1x128xf32>
    %cst_188 = arith.constant 0.000000e+00 : f32
    %362 = vector.broadcast %cst_188 : f32 to vector<1x128xf32>
    %363 = arith.maximumf %361, %362 : vector<1x128xf32>
    %c1_189 = arith.constant 1 : index
    %c0_190 = arith.constant 0 : index
    %364 = memref.load %arg6[%c1_189, %c0_190] : memref<2x4xf32, #tpu.memory_space<smem>>
    %365 = vector.broadcast %364 : f32 to vector<1x128xf32>
    %366 = arith.mulf %259, %365 : vector<1x128xf32>
    %c1_191 = arith.constant 1 : index
    %c1_192 = arith.constant 1 : index
    %367 = memref.load %arg6[%c1_191, %c1_192] : memref<2x4xf32, #tpu.memory_space<smem>>
    %368 = vector.broadcast %367 : f32 to vector<1x128xf32>
    %369 = arith.mulf %287, %368 : vector<1x128xf32>
    %370 = arith.addf %366, %369 : vector<1x128xf32>
    %c1_193 = arith.constant 1 : index
    %c2_194 = arith.constant 2 : index
    %371 = memref.load %arg6[%c1_193, %c2_194] : memref<2x4xf32, #tpu.memory_space<smem>>
    %372 = vector.broadcast %371 : f32 to vector<1x128xf32>
    %373 = arith.mulf %315, %372 : vector<1x128xf32>
    %374 = arith.addf %370, %373 : vector<1x128xf32>
    %c1_195 = arith.constant 1 : index
    %c3_196 = arith.constant 3 : index
    %375 = memref.load %arg6[%c1_195, %c3_196] : memref<2x4xf32, #tpu.memory_space<smem>>
    %376 = vector.broadcast %375 : f32 to vector<1x128xf32>
    %377 = arith.mulf %343, %376 : vector<1x128xf32>
    %378 = arith.addf %374, %377 : vector<1x128xf32>
    %c1_197 = arith.constant 1 : index
    %379 = memref.load %arg7[%c1_197] : memref<2xf32, #tpu.memory_space<smem>>
    %380 = vector.broadcast %379 : f32 to vector<1x128xf32>
    %381 = arith.addf %378, %380 : vector<1x128xf32>
    %cst_198 = arith.constant 0.000000e+00 : f32
    %382 = vector.broadcast %cst_198 : f32 to vector<1x128xf32>
    %383 = arith.maximumf %381, %382 : vector<1x128xf32>
    %c0_199 = arith.constant 0 : index
    %c0_200 = arith.constant 0 : index
    %384 = memref.load %arg8[%c0_199, %c0_200] : memref<1x2xf32, #tpu.memory_space<smem>>
    %385 = vector.broadcast %384 : f32 to vector<1x128xf32>
    %386 = arith.mulf %363, %385 : vector<1x128xf32>
    %c0_201 = arith.constant 0 : index
    %c1_202 = arith.constant 1 : index
    %387 = memref.load %arg8[%c0_201, %c1_202] : memref<1x2xf32, #tpu.memory_space<smem>>
    %388 = vector.broadcast %387 : f32 to vector<1x128xf32>
    %389 = arith.mulf %383, %388 : vector<1x128xf32>
    %390 = arith.addf %386, %389 : vector<1x128xf32>
    %c0_203 = arith.constant 0 : index
    %391 = memref.load %arg9[%c0_203] : memref<1xf32, #tpu.memory_space<smem>>
    %392 = vector.broadcast %391 : f32 to vector<1x128xf32>
    %393 = arith.addf %390, %392 : vector<1x128xf32>
    %cst_204 = arith.constant 0.000000e+00 : f32
    %394 = vector.broadcast %cst_204 : f32 to vector<1x128xf32>
    %395 = arith.maximumf %393, %394 : vector<1x128xf32>
    %c0_205 = arith.constant 0 : index
    %c0_206 = arith.constant 0 : index
    %396 = vector.load %arg10[%c0_205, %c0_206] : memref<1x128xf32, #tpu.memory_space<vmem>>, vector<1x128xf32>
    tpu.vector_store %arg10[%c0_205, %c0_206], %395 {strides = array<i32>} : memref<1x128xf32, #tpu.memory_space<vmem>>, vector<1x128xf32>,
    return
  }
  func.func @transform_0(%arg0: i32) -> (i32, i32, i32) {
    %c0_i32 = arith.constant 0 : i32
    %c0_i32_0 = arith.constant 0 : i32
    %c0_i32_1 = arith.constant 0 : i32
    return %c0_i32, %arg0, %c0_i32_0 : i32, i32, i32
  }
  func.func @transform_1(%arg0: i32) -> (i32, i32) {
    %c0_i32 = arith.constant 0 : i32
    %c0_i32_0 = arith.constant 0 : i32
    %c0_i32_1 = arith.constant 0 : i32
    return %c0_i32, %c0_i32_0 : i32, i32
  }
  func.func @transform_2(%arg0: i32) -> i32 {
    %c0_i32 = arith.constant 0 : i32
    %c0_i32_0 = arith.constant 0 : i32
    return %c0_i32 : i32
  }
  func.func @transform_3(%arg0: i32) -> (i32, i32) {
    %c0_i32 = arith.constant 0 : i32
    %c0_i32_0 = arith.constant 0 : i32
    %c0_i32_1 = arith.constant 0 : i32
    return %c0_i32, %c0_i32_0 : i32, i32
  }
  func.func @transform_4(%arg0: i32) -> i32 {
    %c0_i32 = arith.constant 0 : i32
    %c0_i32_0 = arith.constant 0 : i32
    return %c0_i32 : i32
  }
  func.func @transform_5(%arg0: i32) -> (i32, i32) {
    %c0_i32 = arith.constant 0 : i32
    %c0_i32_0 = arith.constant 0 : i32
    %c0_i32_1 = arith.constant 0 : i32
    return %c0_i32, %c0_i32_0 : i32, i32
  }
  func.func @transform_6(%arg0: i32) -> i32 {
    %c0_i32 = arith.constant 0 : i32
    %c0_i32_0 = arith.constant 0 : i32
    return %c0_i32 : i32
  }
  func.func @transform_7(%arg0: i32) -> (i32, i32) {
    %c0_i32 = arith.constant 0 : i32
    %c0_i32_0 = arith.constant 0 : i32
    %c0_i32_1 = arith.constant 0 : i32
    return %c0_i32, %c0_i32_0 : i32, i32
  }
  func.func @transform_8(%arg0: i32) -> i32 {
    %c0_i32 = arith.constant 0 : i32
    %c0_i32_0 = arith.constant 0 : i32
    return %c0_i32 : i32
  }
  func.func @transform_9(%arg0: i32) -> (i32, i32) {
    %c0_i32 = arith.constant 0 : i32
    %c0_i32_0 = arith.constant 0 : i32
    return %arg0, %c0_i32 : i32, i32
  }
}

</mosaic_0001>

<bundles_post_ra>
// kernel: tpu_custom_call.1
= control target key start
LH: loop header
LB: loop body
LE: loop exit
PB: predicated region body
PF: predicated region fallthrough
CT: control target
= control target key end

     0   :  { %15 = vsyncpa [#allocation4], 0  ;;  %s1243_s0 = inlined_call_operand.hbm [shape: f32[8,1,128], index: 0, kind: input, shape index: {}]   ;;  %s1244_s1 = inlined_call_operand.hbm [shape: f32[6,8], index: 1, kind: input, shape index: {}]   ;;  %s1245_s2 = inlined_call_operand.vmem [shape: f32[6], index: 2, kind: input, shape index: {}]   ;;  %s1246_s3 = inlined_call_operand.vmem [shape: f32[4,6], index: 3, kind: input, shape index: {}]   ;;  %s1247_s4 = inlined_call_operand.vmem [shape: f32[4], index: 4, kind: input, shape index: {}]   ;;  %s1248_s5 = inlined_call_operand.vmem [shape: f32[2,4], index: 5, kind: input, shape index: {}]   ;;  %s1249_s6 = inlined_call_operand.vmem [shape: f32[2], index: 6, kind: input, shape index: {}]   ;;  %s1250_s7 = inlined_call_operand.vmem [shape: f32[1,2], index: 7, kind: input, shape index: {}]   ;;  %s1251_s8 = inlined_call_operand.<no memory space> [shape: f32[1], index: 8, kind: input, shape index: {}]   ;;  %s1252_s9 = inlined_call_operand.hbm [shape: f32[1,128], index: 9, kind: output, shape index: {}]  }
   0x1   :  { %16 = vsyncpa [#allocation6], 0 }
   0x2   :  { %17 = vsyncpa [#allocation7], 0 }
   0x3   :  { %18 = vsyncpa [#allocation11], 0 }
   0x4   :  { %19 = vsyncpa [#allocation14], 0 }
   0x5   :  { %20 = vsyncpa [#allocation17], 0  ;;  %s58_s11 = sshll.u32 %s1246_s3, 4  ;;  %s59_s11 = int_to_ptr.vmem [resolvable:$true] %s58_s11 }
   0x6   :  { %21 = vsyncpa [#allocation5], 0  ;;  %s78_s14 = sshll.u32 %s1248_s5, 4  ;;  %s630_s15 = scalar_lea.vmem %s59_s11, 64  ;;  %s79_s14 = int_to_ptr.vmem [resolvable:$true] %s78_s14 }
   0x7   :  { %p631_p0 = scmp.ne.s32.totalorder %s59_s11, %s630_s15  ;;  %p635_p1 = scmp.lt.s32.totalorder %s59_s11, %s59_s11 }
   0x8   :  { %p636_p2 = scmp.lt.s32.totalorder %s630_s15, %s630_s15 }
   0xa   :  { %p637_p3 = por %p636_p2, %p635_p1 }
   0xc   :  { %p638_p4 = pnand %p637_p3, %p631_p0 }
   0xe   :  { %641 = shalt.err (!%p638_p4)
}
   0xf   :  { %s770_s16 = smov [#allocation10]   ;;  %s642_s17 = scalar_lea.vmem %s79_s14, 32 }
  0x10   :  { %61 = dma.vmem_to_smem %s59_s11, 64, %s770_s16, [#allocation11]  }
  0x11   :  { %p643_p5 = scmp.ne.s32.totalorder %s79_s14, %s642_s17  ;;  %p647_p6 = scmp.lt.s32.totalorder %s79_s14, %s79_s14 }
  0x12   :  { %p648_p7 = scmp.lt.s32.totalorder %s642_s17, %s642_s17 }
  0x14   :  { %p649_p8 = por %p648_p7, %p647_p6 }
  0x16   :  { %p650_p9 = pnand %p649_p8, %p643_p5 }
  0x18   :  { %653 = shalt.err (!%p650_p9)
}
  0x19   :  { %s771_s3 = smov [#allocation13]   ;;  %s772_s5 = smov [#allocation3]  }
  0x1a   :  { %81 = dma.vmem_to_smem %s79_s14, 32, %s771_s3, [#allocation14]  }
  0x1b   :  { %s27_s18 = sshll.u32 %s772_s5, 4  ;;  %s654_s21 = scalar_lea.hbm %s1243_s0, 128  ;;  %s28_s18 = int_to_ptr.vmem [resolvable:$true] %s27_s18 }
  0x1c   :  { %p655_p10 = scmp.ne.s32.totalorder %s1243_s0, %s654_s21  ;;  %p658_p11 = scmp.lt.u32.totalorder %s654_s21, %s1243_s0 }
  0x1e   :  { %p660_p12 = pnand %p658_p11, %p655_p10 }
  0x20   :  { %663 = shalt.err (!%p660_p12)
}
  0x21   :  { %s664_s26 = scalar_lea.vmem %s28_s18, 128  ;;  %p669_p0 = scmp.lt.s32.totalorder %s28_s18, %s28_s18 }
  0x22   :  { %p665_p13 = scmp.ne.s32.totalorder %s28_s18, %s664_s26  ;;  %p670_p1 = scmp.lt.s32.totalorder %s664_s26, %s664_s26 }
  0x24   :  { %p671_p2 = por %p670_p1, %p669_p0 }
  0x26   :  { %p672_p3 = pnand %p671_p2, %p665_p13 }
  0x28   :  { %675 = shalt.err (!%p672_p3)
}
  0x29   :  { %s773_s27 = smov 16   ;;  %s774_s28 = smov 1  }
  0x2a   :  { %33 = dma.hbm_to_vmem [thread:$0]  %s1243_s0, 128, %s28_s18, [#allocation4], %s773_s27, %s773_s27, %s774_s28  }
  0x2b   :  { %s676_s12 = scalar_lea.hbm %s1244_s1, 128 }
  0x2c   :  { %p677_p4 = scmp.ne.s32.totalorder %s1244_s1, %s676_s12  ;;  %p680_p5 = scmp.lt.u32.totalorder %s676_s12, %s1244_s1 }
  0x2e   :  { %p682_p6 = pnand %p680_p5, %p677_p4 }
  0x30   :  { %685 = shalt.err (!%p682_p6)
}
  0x31   :  { %s775_s17 = smov [#allocation8]   ;;  %s48_s19 = sshll.u32 %s1245_s2, 4  ;;  %s49_s19 = int_to_ptr.vmem [resolvable:$true] %s48_s19 }
  0x32   :  { %41 = dma.hbm_to_smem %s1244_s1, 128, %s775_s17, [#allocation6]  }
  0x33   :  { %s68_s22 = sshll.u32 %s1247_s4, 4  ;;  %s686_s23 = scalar_lea.vmem %s49_s19, 16  ;;  %s69_s22 = int_to_ptr.vmem [resolvable:$true] %s68_s22 }
  0x34   :  { %p687_p7 = scmp.ne.s32.totalorder %s49_s19, %s686_s23  ;;  %p691_p8 = scmp.lt.s32.totalorder %s49_s19, %s49_s19 }
  0x35   :  { %p692_p9 = scmp.lt.s32.totalorder %s686_s23, %s686_s23 }
  0x37   :  { %p693_p10 = por %p692_p9, %p691_p8 }
  0x39   :  { %p694_p11 = pnand %p693_p10, %p687_p7 }
  0x3b   :  { %697 = shalt.err (!%p694_p11)
}
  0x3c   :  { %s776_s24 = smov [#allocation9]   ;;  %s698_s1 = scalar_lea.vmem %s69_s22, 16 }
  0x3d   :  { %51 = dma.vmem_to_smem %s49_s19, 16, %s776_s24, [#allocation7]  }
  0x3e   :  { %p699_p12 = scmp.ne.s32.totalorder %s69_s22, %s698_s1  ;;  %p703_p13 = scmp.lt.s32.totalorder %s69_s22, %s69_s22 }
  0x3f   :  { %p704_p0 = scmp.lt.s32.totalorder %s698_s1, %s698_s1 }
  0x41   :  { %p705_p1 = por %p704_p0, %p703_p13 }
  0x43   :  { %p706_p2 = pnand %p705_p1, %p699_p12 }
  0x45   :  { %709 = shalt.err (!%p706_p2)
}
  0x46   :  { %s777_s2 = smov [#allocation12]   ;;  %s88_s26 = sshll.u32 %s1249_s6, 4  ;;  %s89_s26 = int_to_ptr.vmem [resolvable:$true] %s88_s26 }
  0x47   :  { %71 = dma.vmem_to_smem %s69_s22, 16, %s777_s2, [#allocation11]  }
  0x48   :  { %s98_s29 = sshll.u32 %s1250_s7, 4  ;;  %s710_s30 = scalar_lea.vmem %s89_s26, 16  ;;  %s99_s29 = int_to_ptr.vmem [resolvable:$true] %s98_s29 }
  0x49   :  { %p711_p3 = scmp.ne.s32.totalorder %s89_s26, %s710_s30  ;;  %p715_p4 = scmp.lt.s32.totalorder %s89_s26, %s89_s26 }
  0x4a   :  { %p716_p5 = scmp.lt.s32.totalorder %s710_s30, %s710_s30 }
  0x4c   :  { %p717_p6 = por %p716_p5, %p715_p4 }
  0x4e   :  { %p718_p7 = pnand %p717_p6, %p711_p3 }
  0x50   :  { %721 = shalt.err (!%p718_p7)
}
  0x51   :  { %s778_s10 = smov [#allocation15]   ;;  %s722_s11 = scalar_lea.vmem %s99_s29, 16 }
  0x52   :  { %91 = dma.vmem_to_smem %s89_s26, 16, %s778_s10, [#allocation14]  }
  0x53   :  { %p723_p8 = scmp.ne.s32.totalorder %s99_s29, %s722_s11  ;;  %p727_p9 = scmp.lt.s32.totalorder %s99_s29, %s99_s29 }
  0x54   :  { %p728_p10 = scmp.lt.s32.totalorder %s722_s11, %s722_s11 }
  0x56   :  { %p729_p11 = por %p728_p10, %p727_p9 }
  0x58   :  { %p730_p12 = pnand %p729_p11, %p723_p8 }
  0x5a   :  { %733 = shalt.err (!%p730_p12)
}
  0x5b   :  { %s779_s6 = smov [#allocation16]  }
  0x5c   :  { %101 = dma.vmem_to_smem %s99_s29, 16, %s779_s6, [#allocation17]  }
  0x5d   :  { %756 = dma.done.wait [#allocation4], 128  }
  0x5e   :  { %757 = vsyncadd [#allocation4], 4294967168 }
  0x5f   :  { %758 = dma.done.wait [#allocation6], 128  }
  0x60   :  { %759 = vsyncadd [#allocation6], 4294967168 }
  0x61   :  { %760 = dma.done.wait [#allocation7], 16  }
  0x62   :  { %761 = vsyncadd [#allocation7], 4294967280 }
  0x63   :  { %762 = dma.done.wait [#allocation11], 80  }
  0x64   :  { %763 = vsyncadd [#allocation11], 4294967216 }
  0x65   :  { %764 = dma.done.wait [#allocation14], 48  }
  0x66   :  { %765 = vsyncadd [#allocation14], 4294967248 }
  0x67   :  { %766 = dma.done.wait [#allocation17], 16  }
  0x68   :  { %767 = vsyncadd [#allocation17], 4294967280 }
  0x69   :  { %128 = sfence }
  0x6a   :  { %s144_s7 = sld [smem:[#allocation8]]  ;;  %s532_s12 = sld [smem:[#allocation8 + $0x1]]  ;;  %v873_v0 = vld [vmem:[#allocation3] sm:$0x1]  ;;  %v879_v1 = vld [vmem:[#allocation3 + $0x1] sm:$0x1] }
  0x6b   :  { %s533_s13 = sld [smem:[#allocation8 + $0x2]]  ;;  %s875_s14 = sld [smem:[#allocation8 + $0x3]]  ;;  %v885_v2 = vld [vmem:[#allocation3 + $0x2] sm:$0x1]  ;;  %v891_v3 = vld [vmem:[#allocation3 + $0x3] sm:$0x1] }
  0x6c   :  { %s877_s15 = sld [smem:[#allocation8 + $0x4]]  ;;  %s881_s16 = sld [smem:[#allocation8 + $0x5]]  ;;  %v897_v4 = vld [vmem:[#allocation3 + $0x4] sm:$0x1]  ;;  %v903_v6 = vld [vmem:[#allocation3 + $0x5] sm:$0x1] }
  0x6d   :  { %s883_s17 = sld [smem:[#allocation8 + $0x6]]  ;;  %s887_s3 = sld [smem:[#allocation8 + $0x7]]  ;;  %v910_v10 = vld [vmem:[#allocation3 + $0x6] sm:$0x1]  ;;  %v933_v21 = vld [vmem:[#allocation3 + $0x7] sm:$0x1] }
  0x6e   :  { %s889_s5 = sld [smem:[#allocation9]]  ;;  %s895_s18 = sld [smem:[#allocation8 + $0x81]] }
  0x6f   :  { %s893_s0 = sld [smem:[#allocation8 + $0x80]]  ;;  %s899_s19 = sld [smem:[#allocation8 + $0x82]] }
  0x70   :  { %v145_v5 = vstv %s144_s7  ;;  %s901_s20 = sld [smem:[#allocation8 + $0x83]]  ;;  %v148_v8 = vstv %s532_s12  ;;  %s906_s21 = sld [smem:[#allocation8 + $0x84]] }
  0x71   :  { %v146_v7 = vmul.f32 %v145_v5, %v873_v0  ;;  %v152_v9 = vstv %s533_s13  ;;  %s908_s22 = sld [smem:[#allocation8 + $0x85]]  ;;  %v149_v11 = vmul.f32 %v148_v8, %v879_v1  ;;  %v156_v13 = vstv %s875_s14  ;;  %s916_s23 = sld [smem:[#allocation8 + $0x86]] }
  0x72   :  { %v153_v12 = vmul.f32 %v152_v9, %v885_v2  ;;  %v160_v14 = vstv %s877_s15  ;;  %s918_s24 = sld [smem:[#allocation8 + $0x87]]  ;;  %v164_v15 = vstv %s881_s16  ;;  %s922_s1 = sld [smem:[#allocation9 + $0x1]]  ;;  %v157_v18 = vmul.f32 %v156_v13, %v891_v3 }
  0x73   :  { %v168_v16 = vstv %s883_s17  ;;  %s924_s2 = sld [smem:[#allocation8 + $0x100]]  ;;  %v150_v17 = vadd.f32 %v149_v11, %v146_v7  ;;  %v161_v19 = vmul.f32 %v160_v14, %v897_v4  ;;  %v165_v20 = vmul.f32 %v164_v15, %v903_v6  ;;  %s929_s4 = sld [smem:[#allocation8 + $0x101]] }
  0x74   :  { %s931_s25 = sld [smem:[#allocation8 + $0x102]]  ;;  %v169_v22 = vmul.f32 %v168_v16, %v910_v10  ;;  %v172_v23 = vstv %s887_s3  ;;  %v183_v25 = vstv %s895_s18  ;;  %s939_s26 = sld [smem:[#allocation8 + $0x103]]  ;;  %v176_v38 = vstv %s889_s5 }
  0x75   :  { %v180_v24 = vstv %s893_s0  ;;  %s941_s27 = sld [smem:[#allocation8 + $0x104]]  ;;  %v154_v26 = vadd.f32 %v153_v12, %v150_v17  ;;  %v184_v28 = vmul.f32 %v183_v25, %v879_v1  ;;  %v187_v29 = vstv %s899_s19  ;;  %s946_s28 = sld [smem:[#allocation8 + $0x105]] }
  0x76   :  { %v181_v27 = vmul.f32 %v180_v24, %v873_v0  ;;  %v188_v30 = vmul.f32 %v187_v29, %v885_v2  ;;  %v191_v31 = vstv %s901_s20  ;;  %v195_v32 = vstv %s906_s21  ;;  %s952_s29 = sld [smem:[#allocation8 + $0x106]]  ;;  %s954_s30 = sld [smem:[#allocation8 + $0x107]] }
  0x77   :  { %v199_v33 = vstv %s908_s22  ;;  %v158_v34 = vadd.f32 %v157_v18, %v154_v26  ;;  %v173_v35 = vmul.f32 %v172_v23, %v933_v21  ;;  %v192_v37 = vmul.f32 %v191_v31, %v891_v3  ;;  %s958_s10 = sld [smem:[#allocation9 + $0x2]]  ;;  %s960_s11 = sld [smem:[#allocation8 + $0x180]] }
  0x78   :  { %v185_v36 = vadd.f32 %v184_v28, %v181_v27  ;;  %v196_v39 = vmul.f32 %v195_v32, %v897_v4  ;;  %v200_v40 = vmul.f32 %v199_v33, %v903_v6  ;;  %v203_v41 = vstv %s916_s23  ;;  %s966_s6 = sld [smem:[#allocation8 + $0x181]]  ;;  %s968_s7 = sld [smem:[#allocation8 + $0x182]] }
  0x79   :  { %v162_v42 = vadd.f32 %v161_v19, %v158_v34  ;;  %v207_v44 = vstv %s918_s24  ;;  %v211_v45 = vstv %s922_s1  ;;  %v215_v46 = vstv %s924_s2  ;;  %s976_s12 = sld [smem:[#allocation8 + $0x183]]  ;;  %s978_s13 = sld [smem:[#allocation8 + $0x184]] }
  0x7a   :  { %v189_v43 = vadd.f32 %v188_v30, %v185_v36  ;;  %v218_v47 = vstv %s929_s4  ;;  %v222_v48 = vstv %s931_s25  ;;  %v226_v49 = vstv %s939_s26  ;;  %s986_s14 = sld [smem:[#allocation8 + $0x185]]  ;;  %s988_s15 = sld [smem:[#allocation8 + $0x186]] }
  0x7b   :  { %v166_v50 = vadd.f32 %v165_v20, %v162_v42  ;;  %v216_v52 = vmul.f32 %v215_v46, %v873_v0  ;;  %v219_v53 = vmul.f32 %v218_v47, %v879_v1  ;;  %v204_v54 = vmul.f32 %v203_v41, %v910_v10  ;;  %s995_s16 = sld [smem:[#allocation8 + $0x187]]  ;;  %s997_s17 = sld [smem:[#allocation8 + $0x200]] }
  0x7c   :  { %v193_v51 = vadd.f32 %v192_v37, %v189_v43  ;;  %v223_v55 = vmul.f32 %v222_v48, %v885_v2  ;;  %v230_v56 = vstv %s941_s27  ;;  %v234_v57 = vstv %s946_s28  ;;  %s1000_s3 = sld [smem:[#allocation9 + $0x3]]  ;;  %s1002_s5 = sld [smem:[#allocation8 + $0x201]] }
  0x7d   :  { %v170_v58 = vadd.f32 %v169_v22, %v166_v50  ;;  %v220_v60 = vadd.f32 %v219_v53, %v216_v52  ;;  %v227_v61 = vmul.f32 %v226_v49, %v891_v3  ;;  %v208_v62 = vmul.f32 %v207_v44, %v933_v21  ;;  %s1008_s0 = sld [smem:[#allocation8 + $0x202]]  ;;  %s1010_s18 = sld [smem:[#allocation8 + $0x203]] }
  0x7e   :  { %v197_v59 = vadd.f32 %v196_v39, %v193_v51  ;;  %v231_v63 = vmul.f32 %v230_v56, %v897_v4  ;;  %v235_v5 = vmul.f32 %v234_v57, %v903_v6  ;;  %v238_v7 = vstv %s952_s29  ;;  %s1013_s19 = sld [smem:[#allocation8 + $0x204]]  ;;  %s1019_s20 = sld [smem:[#allocation8 + $0x205]] }
  0x7f   :  { %v174_v8 = vadd.f32 %v173_v35, %v170_v58  ;;  %v224_v11 = vadd.f32 %v223_v55, %v220_v60  ;;  %v242_v12 = vstv %s954_s30  ;;  %v246_v13 = vstv %s958_s10  ;;  %s1021_s21 = sld [smem:[#allocation8 + $0x206]]  ;;  %s1028_s22 = sld [smem:[#allocation8 + $0x207]] }
  0x80   :  { %v201_v9 = vadd.f32 %v200_v40, %v197_v59  ;;  %v250_v14 = vstv %s960_s11  ;;  %v253_v15 = vstv %s966_s6  ;;  %v257_v16 = vstv %s968_s7  ;;  %s1033_s23 = sld [smem:[#allocation9 + $0x4]]  ;;  %s1035_s24 = sld [smem:[#allocation8 + $0x280]] }
  0x81   :  { %v177_v17 = vadd.f32 %v176_v38, %v174_v8  ;;  %v228_v19 = vadd.f32 %v227_v61, %v224_v11  ;;  %v251_v20 = vmul.f32 %v250_v14, %v873_v0  ;;  %v254_v22 = vmul.f32 %v253_v15, %v879_v1  ;;  %s1040_s1 = sld [smem:[#allocation8 + $0x281]]  ;;  %s1042_s2 = sld [smem:[#allocation8 + $0x282]] }
  0x82   :  { %v205_v18 = vadd.f32 %v204_v54, %v201_v9  ;;  %v258_v23 = vmul.f32 %v257_v16, %v885_v2  ;;  %v261_v24 = vstv %s976_s12  ;;  %v265_v25 = vstv %s978_s13  ;;  %s1047_s4 = sld [smem:[#allocation8 + $0x283]]  ;;  %s1052_s25 = sld [smem:[#allocation8 + $0x284]] }
  0x83   :  { %v232_v27 = vadd.f32 %v231_v63, %v228_v19  ;;  %v239_v28 = vmul.f32 %v238_v7, %v910_v10  ;;  %v243_v29 = vmul.f32 %v242_v12, %v933_v21  ;;  %v255_v30 = vadd.f32 %v254_v22, %v251_v20  ;;  %s1054_s26 = sld [smem:[#allocation8 + $0x285]]  ;;  %s1063_s27 = sld [smem:[#allocation8 + $0x286]] }
  0x84   :  { %v209_v26 = vadd.f32 %v208_v62, %v205_v18  ;;  %v262_v31 = vmul.f32 %v261_v24, %v891_v3  ;;  %v269_v32 = vstv %s986_s14  ;;  %v273_v33 = vstv %s988_s15  ;;  %s1065_s28 = sld [smem:[#allocation8 + $0x287]]  ;;  %s1069_s29 = sld [smem:[#allocation9 + $0x5]] }
  0x85   :  { %v1030_v34 = vmax.f32 %v177_v17, 0.0  ;;  %v236_v36 = vadd.f32 %v235_v5, %v232_v27  ;;  %v266_v37 = vmul.f32 %v265_v25, %v897_v4  ;;  %v259_v38 = vadd.f32 %v258_v23, %v255_v30  ;;  %s1071_s30 = sld [smem:[#allocation10]]  ;;  %s1076_s10 = sld [smem:[#allocation10 + $0x1]] }
  0x86   :  { %v212_v35 = vadd.f32 %v211_v45, %v209_v26  ;;  %v270_v39 = vmul.f32 %v269_v32, %v903_v6  ;;  %v274_v40 = vmul.f32 %v273_v33, %v910_v10  ;;  %v285_v41 = vstv %s997_s17  ;;  %s1078_s11 = sld [smem:[#allocation10 + $0x2]]  ;;  %s1086_s6 = sld [smem:[#allocation10 + $0x3]] }
  0x87   :  { %v240_v42 = vadd.f32 %v239_v28, %v236_v36  ;;  %v277_v43 = vstv %s995_s16  ;;  %v281_v44 = vstv %s1000_s3  ;;  %v286_v45 = vmul.f32 %v285_v41, %v873_v0  ;;  %s1091_s7 = sld [smem:[#allocation10 + $0x4]]  ;;  %s1093_s12 = sld [smem:[#allocation10 + $0x80]] }
  0x88   :  { %v263_v46 = vadd.f32 %v262_v31, %v259_v38  ;;  %v288_v47 = vstv %s1002_s5  ;;  %v292_v48 = vstv %s1008_s0  ;;  %v296_v49 = vstv %s1010_s18  ;;  %s1099_s13 = sld [smem:[#allocation10 + $0x81]]  ;;  %s1101_s14 = sld [smem:[#allocation10 + $0x82]] }
  0x89   :  { %v1056_v50 = vmax.f32 %v212_v35, 0.0  ;;  %v244_v51 = vadd.f32 %v243_v29, %v240_v42  ;;  %v289_v52 = vmul.f32 %v288_v47, %v879_v1  ;;  %v293_v53 = vmul.f32 %v292_v48, %v885_v2  ;;  %s1108_s15 = sld [smem:[#allocation10 + $0x83]]  ;;  %s1110_s16 = sld [smem:[#allocation10 + $0x84]] }
  0x8a   :  { %v267_v54 = vadd.f32 %v266_v37, %v263_v46  ;;  %v300_v55 = vstv %s1013_s19  ;;  %v304_v56 = vstv %s1019_s20  ;;  %v308_v57 = vstv %s1021_s21  ;;  %s1114_s17 = sld [smem:[#allocation10 + $0x5]]  ;;  %s1116_s3 = sld [smem:[#allocation12]] }
  0x8b   :  { %v247_v58 = vadd.f32 %v246_v13, %v244_v51  ;;  %v278_v59 = vmul.f32 %v277_v43, %v933_v21  ;;  %v290_v60 = vadd.f32 %v289_v52, %v286_v45  ;;  %v297_v61 = vmul.f32 %v296_v49, %v891_v3  ;;  %s1123_s5 = sld [smem:[#allocation10 + $0x100]]  ;;  %s1127_s0 = sld [smem:[#allocation10 + $0x101]] }
  0x8c   :  { %v271_v62 = vadd.f32 %v270_v39, %v267_v54  ;;  %v301_v63 = vmul.f32 %v300_v55, %v897_v4  ;;  %v305_v5 = vmul.f32 %v304_v56, %v903_v6  ;;  %v309_v7 = vmul.f32 %v308_v57, %v910_v10  ;;  %s1133_s18 = sld [smem:[#allocation10 + $0x102]]  ;;  %s1135_s19 = sld [smem:[#allocation10 + $0x103]] }
  0x8d   :  { %v294_v8 = vadd.f32 %v293_v53, %v290_v60  ;;  %v312_v9 = vstv %s1028_s22  ;;  %v316_v11 = vstv %s1033_s23  ;;  %v320_v12 = vstv %s1035_s24  ;;  %s1138_s20 = sld [smem:[#allocation10 + $0x85]]  ;;  %s1144_s21 = sld [smem:[#allocation12 + $0x1]] }
  0x8e   :  { %v275_v13 = vadd.f32 %v274_v40, %v271_v62  ;;  %v321_v14 = vmul.f32 %v320_v12, %v873_v0  ;;  %v323_v15 = vstv %s1040_s1  ;;  %v327_v16 = vstv %s1042_s2  ;;  %s1146_s22 = sld [smem:[#allocation10 + $0x104]]  ;;  %s1149_s23 = sld [smem:[#allocation10 + $0x105]] }
  0x8f   :  { %v298_v17 = vadd.f32 %v297_v61, %v294_v8  ;;  %v324_v18 = vmul.f32 %v323_v15, %v879_v1  ;;  %v328_v19 = vmul.f32 %v327_v16, %v885_v2  ;;  %v331_v20 = vstv %s1047_s4  ;;  %s1151_s24 = sld [smem:[#allocation10 + $0x180]]  ;;  %s1157_s1 = sld [smem:[#allocation10 + $0x181]] }
  0x90   :  { %v1095_v22 = vmax.f32 %v247_v58, 0.0  ;;  %v279_v23 = vadd.f32 %v278_v59, %v275_v13  ;;  %v335_v24 = vstv %s1052_s25  ;;  %v339_v0 = vstv %s1054_s26  ;;  %s1159_s2 = sld [smem:[#allocation10 + $0x182]]  ;;  %s1167_s4 = sld [smem:[#allocation10 + $0x183]] }
  0x91   :  { %v302_v1 = vadd.f32 %v301_v63, %v298_v17  ;;  %v313_v2 = vmul.f32 %v312_v9, %v933_v21  ;;  %v325_v25 = vadd.f32 %v324_v18, %v321_v14  ;;  %v332_v26 = vmul.f32 %v331_v20, %v891_v3  ;;  %s1175_s25 = sld [smem:[#allocation12 + $0x2]]  ;;  %s1177_s26 = sld [smem:[#allocation10 + $0x184]] }
  0x92   :  { %v282_v27 = vadd.f32 %v281_v44, %v279_v23  ;;  %v336_v28 = vmul.f32 %v335_v24, %v897_v4  ;;  %v340_v29 = vmul.f32 %v339_v0, %v903_v6  ;;  %v343_v30 = vstv %s1063_s27  ;;  %s1182_s27 = sld [smem:[#allocation10 + $0x185]] }
  0x93   :  { %v306_v31 = vadd.f32 %v305_v5, %v302_v1  ;;  %v329_v32 = vadd.f32 %v328_v19, %v325_v25  ;;  %v347_v33 = vstv %s1065_s28  ;;  %v351_v35 = vstv %s1069_s29  ;;  %s1186_s28 = sld [smem:[#allocation13]]  ;;  %s1188_s29 = sld [smem:[#allocation13 + $0x1]] }
  0x94   :  { %v1118_v3 = vmax.f32 %v282_v27, 0.0  ;;  %v355_v36 = vstv %s1071_s30  ;;  %v358_v4 = vstv %s1076_s10  ;;  %v362_v37 = vstv %s1078_s11  ;;  %s1195_s30 = sld [smem:[#allocation13 + $0x80]]  ;;  %s1198_s10 = sld [smem:[#allocation13 + $0x2]] }
  0x95   :  { %v310_v6 = vadd.f32 %v309_v7, %v306_v31  ;;  %v333_v38 = vadd.f32 %v332_v26, %v329_v32  ;;  %v356_v39 = vmul.f32 %v355_v36, %v1030_v34  ;;  %v359_v40 = vmul.f32 %v358_v4, %v1056_v50  ;;  %s1204_s11 = sld [smem:[#allocation13 + $0x81]] }
  0x96   :  { %v344_v41 = vmul.f32 %v343_v30, %v910_v10  ;;  %v348_v42 = vmul.f32 %v347_v33, %v933_v21  ;;  %v363_v43 = vmul.f32 %v362_v37, %v1095_v22  ;;  %v366_v44 = vstv %s1086_s6  ;;  %s1206_s6 = sld [smem:[#allocation13 + $0x82]] }
  0x97   :  { %v314_v45 = vadd.f32 %v313_v2, %v310_v6  ;;  %v337_v46 = vadd.f32 %v336_v28, %v333_v38  ;;  %v360_v47 = vadd.f32 %v359_v40, %v356_v39  ;;  %v370_v48 = vstv %s1091_s7  ;;  %s1208_s7 = sld [smem:[#allocation12 + $0x3]] }
  0x98   :  { %v367_v49 = vmul.f32 %v366_v44, %v1118_v3  ;;  %v382_v10 = vstv %s1093_s12  ;;  %v385_v51 = vstv %s1099_s13  ;;  %v389_v21 = vstv %s1101_s14  ;;  %s1217_s12 = sld [smem:[#allocation13 + $0x3]]  ;;  %s477_s14 = sld [smem:[#allocation15]] }
  0x99   :  { %v317_v52 = vadd.f32 %v316_v11, %v314_v45  ;;  %v341_v53 = vadd.f32 %v340_v29, %v337_v46  ;;  %v364_v54 = vadd.f32 %v363_v43, %v360_v47  ;;  %v383_v55 = vmul.f32 %v382_v10, %v1030_v34  ;;  %s1219_s13 = sld [smem:[#allocation13 + $0x83]] }
  0x9a   :  { %v386_v56 = vmul.f32 %v385_v51, %v1056_v50  ;;  %v390_v57 = vmul.f32 %v389_v21, %v1095_v22  ;;  %v393_v58 = vstv %s1108_s15  ;;  %v397_v59 = vstv %s1110_s16  ;;  %s617_s15 = sld [smem:[#allocation15 + $0x1]]  ;;  %s500_s16 = sld [smem:[#allocation16]] }
  0x9b   :  { %v1161_v60 = vmax.f32 %v317_v52, 0.0  ;;  %v345_v61 = vadd.f32 %v344_v41, %v341_v53  ;;  %v374_v62 = vstv %s1114_s17  ;;  %v378_v63 = vstv %s1116_s3  ;;  %s618_s17 = sld [smem:[#allocation16 + $0x1]] }
  0x9c   :  { %v368_v5 = vadd.f32 %v367_v49, %v364_v54  ;;  %v387_v7 = vadd.f32 %v386_v56, %v383_v55  ;;  %v394_v8 = vmul.f32 %v393_v58, %v1118_v3  ;;  %v409_v9 = vstv %s1123_s5 }
  0x9d   :  { %v349_v11 = vadd.f32 %v348_v42, %v345_v61  ;;  %v371_v12 = vmul.f32 %v370_v48, %v1161_v60  ;;  %v398_v13 = vmul.f32 %v397_v59, %v1161_v60  ;;  %v410_v14 = vmul.f32 %v409_v9, %v1030_v34 }
  0x9e   :  { %v391_v15 = vadd.f32 %v390_v57, %v387_v7  ;;  %v412_v16 = vstv %s1127_s0  ;;  %v416_v17 = vstv %s1133_s18  ;;  %v420_v18 = vstv %s1135_s19  ;;  %s780_s0 = smov [#allocation18]  }
  0x9f   :  { %v352_v19 = vadd.f32 %v351_v35, %v349_v11  ;;  %v401_v20 = vstv %s1138_s20  ;;  %v413_v23 = vmul.f32 %v412_v16, %v1056_v50  ;;  %v417_v24 = vmul.f32 %v416_v17, %v1095_v22  ;;  %s518_s18 = sshll.u32 %s780_s0, 4  ;;  %s519_s18 = int_to_ptr.vmem [resolvable:$true] %s518_s18 }
  0xa0   :  { %v372_v0 = vadd.f32 %v371_v12, %v368_v5  ;;  %v395_v1 = vadd.f32 %v394_v8, %v391_v15  ;;  %v405_v2 = vstv %s1144_s21  ;;  %v424_v25 = vstv %s1146_s22  ;;  %s734_s19 = scalar_lea.vmem %s519_s18, 16  ;;  %s738_s20 = scalar_lea.vmem %s519_s18, 32 }
  0xa1   :  { %v353_v26 = vmax.f32 %v352_v19, 0.0  ;;  %v414_v27 = vadd.f32 %v413_v23, %v410_v14  ;;  %v421_v28 = vmul.f32 %v420_v18, %v1118_v3  ;;  %v428_v29 = vstv %s1149_s23  ;;  %p735_p13 = scmp.ne.s32.totalorder %s519_s18, %s734_s19  ;;  %p739_p0 = scmp.lt.s32.totalorder %s519_s18, %s519_s18 }
  0xa2   :  { %v399_v30 = vadd.f32 %v398_v13, %v395_v1  ;;  %v436_v31 = vstv %s1151_s24  ;;  %v439_v32 = vstv %s1157_s1  ;;  %v443_v33 = vstv %s1159_s2  ;;  %p740_p1 = scmp.lt.s32.totalorder %s738_s20, %s734_s19 }
  0xa3   :  { %v375_v35 = vmul.f32 %v374_v62, %v353_v26  ;;  %v402_v36 = vmul.f32 %v401_v20, %v353_v26  ;;  %v418_v4 = vadd.f32 %v417_v24, %v414_v27  ;;  %v425_v37 = vmul.f32 %v424_v25, %v1161_v60 }
  0xa4   :  { %v437_v6 = vmul.f32 %v436_v31, %v1030_v34  ;;  %v440_v38 = vmul.f32 %v439_v32, %v1056_v50  ;;  %v444_v39 = vmul.f32 %v443_v33, %v1095_v22  ;;  %v447_v40 = vstv %s1167_s4  ;;  %p741_p2 = por %p740_p1, %p739_p0 }
  0xa5   :  { %v376_v41 = vadd.f32 %v375_v35, %v372_v0  ;;  %v403_v42 = vadd.f32 %v402_v36, %v399_v30  ;;  %v422_v43 = vadd.f32 %v421_v28, %v418_v4  ;;  %v429_v44 = vmul.f32 %v428_v29, %v353_v26 }
  0xa6   :  { %v432_v45 = vstv %s1175_s25  ;;  %v441_v34 = vadd.f32 %v440_v38, %v437_v6  ;;  %v448_v50 = vmul.f32 %v447_v40, %v1118_v3  ;;  %v451_v46 = vstv %s1177_s26  ;;  %p742_p3 = pnand %p741_p2, %p735_p13 }
  0xa7   :  { %v379_v22 = vadd.f32 %v378_v63, %v376_v41  ;;  %v406_v47 = vadd.f32 %v405_v2, %v403_v42  ;;  %v426_v48 = vadd.f32 %v425_v37, %v422_v43  ;;  %v455_v49 = vstv %s1182_s27 }
  0xa8   :  { %v445_v10 = vadd.f32 %v444_v39, %v441_v34  ;;  %v452_v51 = vmul.f32 %v451_v46, %v1161_v60  ;;  %v463_v21 = vstv %s1186_s28  ;;  %v466_v52 = vstv %s1188_s29 }
  0xa9   :  { %v380_v53 = vmax.f32 %v379_v22, 0.0  ;;  %v407_v54 = vmax.f32 %v406_v47, 0.0  ;;  %v430_v55 = vadd.f32 %v429_v44, %v426_v48  ;;  %v456_v56 = vmul.f32 %v455_v49, %v353_v26 }
  0xaa   :  { %v449_v3 = vadd.f32 %v448_v50, %v445_v10  ;;  %v482_v57 = vstv %s1195_s30  ;;  %v470_v63 = vstv %s1198_s10  ;;  %v485_v5 = vstv %s1204_s11 }
  0xab   :  { %v433_v58 = vadd.f32 %v432_v45, %v430_v55  ;;  %v464_v59 = vmul.f32 %v463_v21, %v380_v53  ;;  %v467_v61 = vmul.f32 %v466_v52, %v407_v54  ;;  %v483_v60 = vmul.f32 %v482_v57, %v380_v53 }
  0xac   :  { %v453_v62 = vadd.f32 %v452_v51, %v449_v3  ;;  %v489_v7 = vstv %s1206_s6  ;;  %v459_v9 = vstv %s1208_s7  ;;  %v486_v11 = vmul.f32 %v485_v5, %v407_v54 }
  0xad   :  { %v434_v8 = vmax.f32 %v433_v58, 0.0  ;;  %v468_v13 = vadd.f32 %v467_v61, %v464_v59  ;;  %v474_v18 = vstv %s1217_s12  ;;  %v493_v19 = vstv %s1219_s13 }
  0xae   :  { %v457_v12 = vadd.f32 %v456_v56, %v453_v62  ;;  %v487_v15 = vadd.f32 %v486_v11, %v483_v60  ;;  %v478_v2 = vstv %s477_s14  ;;  %v497_v25 = vstv %s617_s15 }
  0xaf   :  { %v471_v14 = vmul.f32 %v470_v63, %v434_v8  ;;  %v490_v16 = vmul.f32 %v489_v7, %v434_v8  ;;  %v501_v30 = vstv %s500_s16  ;;  %v504_v31 = vstv %s618_s17 }
  0xb0   :  { %v460_v17 = vadd.f32 %v459_v9, %v457_v12  ;;  %v508_v4 = vstv %s1251_s8 }
  0xb1   :  { %v472_v23 = vadd.f32 %v471_v14, %v468_v13  ;;  %v491_v24 = vadd.f32 %v490_v16, %v487_v15 }
  0xb2   :  { %v461_v20 = vmax.f32 %v460_v17, 0.0 }
  0xb4   :  { %v475_v0 = vmul.f32 %v474_v18, %v461_v20  ;;  %v494_v1 = vmul.f32 %v493_v19, %v461_v20 }
  0xb6   :  { %v476_v26 = vadd.f32 %v475_v0, %v472_v23  ;;  %v495_v27 = vadd.f32 %v494_v1, %v491_v24 }
  0xb8   :  { %v479_v28 = vadd.f32 %v478_v2, %v476_v26  ;;  %v498_v29 = vadd.f32 %v497_v25, %v495_v27 }
  0xba   :  { %v480_v32 = vmax.f32 %v479_v28, 0.0  ;;  %v499_v33 = vmax.f32 %v498_v29, 0.0 }
  0xbc   :  { %v502_v35 = vmul.f32 %v501_v30, %v480_v32  ;;  %v505_v36 = vmul.f32 %v504_v31, %v499_v33 }
  0xbe   :  { %v506_v37 = vadd.f32 %v505_v36, %v502_v35 }
  0xc0   :  { %v509_v6 = vadd.f32 %v508_v4, %v506_v37 }
  0xc2   :  { %v510_v38 = vmax.f32 %v509_v6, 0.0 }
  0xc4   :  { %511 = vst [vmem:[#allocation18] sm:$0x1] %v510_v38 }
  0xc5   :  { %745 = shalt.err (!%p742_p3)
}
  0xc6   :  { %s746_s23 = scalar_lea.hbm %s1252_s9, 16 }
  0xc7   :  { %p747_p4 = scmp.ne.s32.totalorder %s1252_s9, %s746_s23  ;;  %p750_p5 = scmp.lt.u32.totalorder %s746_s23, %s1252_s9 }
  0xc9   :  { %p752_p6 = pnand %p750_p5, %p747_p4 }
  0xcb   :  { %755 = shalt.err (!%p752_p6)
}
  0xcc   :  { %521 = dma.vmem_to_hbm [thread:$0]  %s519_s18, 16, %s1252_s9, [#allocation5]  }
  0xcd   :  { %768 = dma.done.wait [#allocation5], 16  }
  0xce   :  { %769 = vsyncadd [#allocation5], 4294967280 }
  0xcf   :  { %525 = vsyncpa [#allocation4], 1 }
  0xd0   :  { %526 = vsyncpa [#allocation5], 1 }
  0xd1   :  { %527 = vsyncpa [#allocation6], 1 }
  0xd2   :  { %528 = vsyncpa [#allocation7], 1 }
  0xd3   :  { %529 = vsyncpa [#allocation11], 1 }
  0xd4   :  { %530 = vsyncpa [#allocation14], 1 }
  0xd5   :  { %531 = vsyncpa [#allocation17], 1 }

</bundles_post_ra>
